<compile_context>
chip_gen: v7x
topology: tpu7x:2x2x1
jax: 0.10.0
libtpu: 0.0.40
codegen_flags: <defaults>
</compile_context>

<pallas_src>
import functools

import jax
import jax.numpy as jnp
from jax.experimental import pallas as pl
from jax.experimental.pallas import tpu as pltpu


HIDDEN = 256


def _silu(x):
    return x * jax.nn.sigmoid(x)


def value_net_kernel(x_ref, w1_ref, b1_ref, w2_ref, b2_ref, w3_ref, b3_ref,
                     o_ref):
    """Fused 3-layer MLP.  bf16 MXU matmuls, f32 accumulation, f32 bias/SiLU.
    Output written lane-dense as a (1, tm) row."""
    x = x_ref[...].astype(jnp.bfloat16)                        # (tm, obs_dim)

    # Layer 1: (tm, obs_dim) @ (obs_dim, 256) -> (tm, 256), f32 accum.
    h1 = jnp.dot(x, w1_ref[...], preferred_element_type=jnp.float32)
    h1 = _silu(h1 + b1_ref[...])                               # f32

    # Layer 2: (tm, 256) @ (256, 256) -> (tm, 256), f32 accum.
    h2 = jnp.dot(h1.astype(jnp.bfloat16), w2_ref[...],
                 preferred_element_type=jnp.float32)
    h2 = _silu(h2 + b2_ref[...])                               # f32

    # Layer 3 (lane-dense): contract w3 row (1, 256) with h2 (tm, 256) along
    # the hidden axis -> (1, tm).  Avoids an N=1 MXU pass and masked stores.
    out = jax.lax.dot_general(
        w3_ref[...], h2.astype(jnp.bfloat16),
        dimension_numbers=(((1,), (1,)), ((), ())),
        preferred_element_type=jnp.float32)                    # (1, tm)

    o_ref[...] = (out + b3_ref[0]).astype(o_ref.dtype)


@functools.partial(jax.jit, static_argnames=("block_batch",))
def value_network_forward(x_raw, params, *, block_batch=512):
    """Pallas implementation of ValueNetwork.forward.

    x_raw:  (B, obs_dim) array (any real dtype; matmuls run in bf16 with f32
            accumulation, bias/SiLU in f32 -- `.float()`-like semantics).
    params: dict with w1 (obs_dim,256), b1 (256,), w2 (256,256), b2 (256,),
            w3 (256,1), b3 (1,)   -- weights stored transposed vs. nn.Linear.
    returns (B,) float32, matching `.squeeze(-1)`.
    """
    B, obs_dim = x_raw.shape

    # Batch tile selection.  If the whole batch fits in one tile, use it
    # (grid of 1, block == full array so no (8,128) constraint applies).
    # Otherwise the tile must be a multiple of 128 so the lane-dense output
    # tiles cleanly.
    if B <= block_batch:
        tm = B
    else:
        assert block_batch % 128 == 0, "block_batch must be a multiple of 128"
        tm = block_batch
    n_steps = -(-B // tm)           # ceil-div
    B_pad = n_steps * tm
    if B_pad != B:
        x_raw = jnp.pad(x_raw, ((0, B_pad - B), (0, 0)))

    # Weights in bf16 (halves weight HBM traffic, MXU-native); biases in f32.
    w1 = params["w1"].astype(jnp.bfloat16)                     # (obs_dim, 256)
    b1 = params["b1"].astype(jnp.float32).reshape(1, HIDDEN)
    w2 = params["w2"].astype(jnp.bfloat16)                     # (256, 256)
    b2 = params["b2"].astype(jnp.float32).reshape(1, HIDDEN)
    w3 = params["w3"].astype(jnp.bfloat16).reshape(1, HIDDEN)  # row form
    b3 = params["b3"].astype(jnp.float32).reshape(1,)          # scalar in SMEM

    # VMEM footprint at hidden=256: weights ~ (obs_dim*256 + 256*256 + 256)
    # bf16 (~160 KiB) + per-step activations (tm x max(obs_dim,256) f32) --
    # comfortably below the 32 MiB scoped default, so no vmem_limit override.
    out = pl.pallas_call(
        value_net_kernel,
        out_shape=jax.ShapeDtypeStruct((1, B_pad), jnp.float32),
        grid_spec=pltpu.PrefetchScalarGridSpec(
            num_scalar_prefetch=0,
            grid=(n_steps,),
            in_specs=[
                # batch-tiled activations (cast to bf16 inside the kernel)
                pl.BlockSpec((tm, obs_dim), lambda i: (i, 0)),
                # weights / biases: full arrays, resident across the grid
                pl.BlockSpec((obs_dim, HIDDEN), lambda i: (0, 0)),
                pl.BlockSpec((1, HIDDEN), lambda i: (0, 0)),
                pl.BlockSpec((HIDDEN, HIDDEN), lambda i: (0, 0)),
                pl.BlockSpec((1, HIDDEN), lambda i: (0, 0)),
                pl.BlockSpec((1, HIDDEN), lambda i: (0, 0)),
                # b3: single scalar kept in SMEM (no padded VMEM tile)
                pl.BlockSpec(memory_space=pltpu.MemorySpace.SMEM),
            ],
            # lane-dense output: (1, tm) slab per grid step
            out_specs=pl.BlockSpec((1, tm), lambda i: (0, i)),
        ),
        compiler_params=pltpu.CompilerParams(
            dimension_semantics=("parallel",)),
    )(x_raw, w1, b1, w2, b2, w3, b3)

    return out[0, :B]  # .squeeze(-1), trim batch padding


def init_params(key, obs_dim):
    """Deterministic init matching nn.Linear shapes (stored transposed)."""
    ks = jax.random.split(key, 6)

    def linear(kw, kb, fan_in, fan_out):
        bound = 1.0 / jnp.sqrt(fan_in)
        w = jax.random.uniform(kw, (fan_in, fan_out), jnp.float32,
                               -bound, bound)
        b = jax.random.uniform(kb, (fan_out,), jnp.float32, -bound, bound)
        return w, b

    w1, b1 = linear(ks[0], ks[1], obs_dim, HIDDEN)
    w2, b2 = linear(ks[2], ks[3], HIDDEN, HIDDEN)
    w3, b3 = linear(ks[4], ks[5], HIDDEN, 1)
    return {"w1": w1, "b1": b1, "w2": w2, "b2": b2, "w3": w3, "b3": b3}


def _reference_forward_f32(x, p):
    """Pure-f32 reference (matches the PyTorch module exactly)."""
    h1 = _silu(x @ p["w1"] + p["b1"])
    h2 = _silu(h1 @ p["w2"] + p["b2"])
    return (h2 @ p["w3"] + p["b3"])[:, 0]


def _reference_forward_bf16(x, p):
    """Reference with the same bf16-operand / f32-accumulate matmuls as the kernel."""
    bf = jnp.bfloat16
    h1 = _silu(jnp.dot(x.astype(bf), p["w1"].astype(bf),
                       preferred_element_type=jnp.float32) + p["b1"])
    h2 = _silu(jnp.dot(h1.astype(bf), p["w2"].astype(bf),
                       preferred_element_type=jnp.float32) + p["b2"])
    out = jnp.dot(h2.astype(bf), p["w3"].astype(bf),
                  preferred_element_type=jnp.float32) + p["b3"]
    return out[:, 0]


if __name__ == "__main__":
    key = jax.random.PRNGKey(0)
    k_param, k_x1, k_x2 = jax.random.split(key, 3)

    obs_dim = 16                    # obs_dim = prod(obs_space.shape)
    params = init_params(k_param, obs_dim)

    # --- small batch: single-step grid, tile == full batch -----------------
    batch = 8
    x = jax.random.normal(k_x1, (batch, obs_dim), jnp.float32)
    out = jax.block_until_ready(value_network_forward(x, params))
    assert out.shape == (batch,)
    ref_bf16 = _reference_forward_bf16(x, params)
    ref_f32 = _reference_forward_f32(x, params)
    assert jnp.allclose(out, ref_bf16, atol=1e-3, rtol=1e-3), "mismatch (bf16 ref)"
    assert jnp.allclose(out, ref_f32, atol=5e-2, rtol=5e-2), "mismatch (f32 ref)"

    # --- larger, non-divisible batch: multi-step grid + padding path -------
    batch2 = 300
    x2 = jax.random.normal(k_x2, (batch2, obs_dim), jnp.float32)
    out2 = jax.block_until_ready(
        value_network_forward(x2, params, block_batch=128))
    assert out2.shape == (batch2,)
    ref2_bf16 = _reference_forward_bf16(x2, params)
    ref2_f32 = _reference_forward_f32(x2, params)
    assert jnp.allclose(out2, ref2_bf16, atol=1e-3, rtol=1e-3), "mismatch (bf16 ref, tiled)"
    assert jnp.allclose(out2, ref2_f32, atol=5e-2, rtol=5e-2), "mismatch (f32 ref, tiled)"

    print("KERNEL_OK")
</pallas_src>

<mosaic_0001>
module attributes {stable_mosaic.version = 11 : i64} {
  func.func @value_net_kernel(%arg0: i32, %arg1: memref<8x16xf32, #tpu.memory_space<vmem>>, %arg2: memref<16x256xbf16, #tpu.memory_space<vmem>>, %arg3: memref<1x256xf32, #tpu.memory_space<vmem>>, %arg4: memref<256x256xbf16, #tpu.memory_space<vmem>>, %arg5: memref<1x256xf32, #tpu.memory_space<vmem>>, %arg6: memref<1x256xbf16, #tpu.memory_space<vmem>>, %arg7: memref<1xf32, #tpu.memory_space<smem>>, %arg8: memref<1x8xf32, #tpu.memory_space<vmem>>) attributes {dimension_semantics = [#tpu.dimension_semantics<parallel>], iteration_bounds = array<i64: 1>, scalar_prefetch = 0 : i64, scratch_operands = 0 : i64, tpu.core_type = #tpu.core_type<tc>, window_params = [{transform_indices = @transform_0, window_bounds = array<i64: 8, 16>}, {pipeline_mode = #tpu.pipeline_mode<synchronous>, transform_indices = @transform_1, window_bounds = array<i64: 16, 256>}, {pipeline_mode = #tpu.pipeline_mode<synchronous>, transform_indices = @transform_2, window_bounds = array<i64: 1, 256>}, {pipeline_mode = #tpu.pipeline_mode<synchronous>, transform_indices = @transform_3, window_bounds = array<i64: 256, 256>}, {pipeline_mode = #tpu.pipeline_mode<synchronous>, transform_indices = @transform_4, window_bounds = array<i64: 1, 256>}, {pipeline_mode = #tpu.pipeline_mode<synchronous>, transform_indices = @transform_5, window_bounds = array<i64: 1, 256>}, {transform_indices = @transform_6, window_bounds = array<i64: 1>}, {transform_indices = @transform_7, window_bounds = array<i64: 1, 8>}]} {
    %c0 = arith.constant 0 : index
    %c0_0 = arith.constant 0 : index
    %0 = vector.load %arg1[%c0, %c0_0] : memref<8x16xf32, #tpu.memory_space<vmem>>, vector<8x16xf32>
    %1 = arith.truncf %0 : vector<8x16xf32> to vector<8x16xbf16>
    %c0_1 = arith.constant 0 : index
    %c0_2 = arith.constant 0 : index
    %2 = vector.load %arg2[%c0_1, %c0_2] : memref<16x256xbf16, #tpu.memory_space<vmem>>, vector<16x256xbf16>
    %cst = arith.constant dense<0.000000e+00> : vector<8x256xf32>
    %3 = tpu.matmul %1, %2, %cst {dimension_numbers = #tpu.dot_dimension_numbers<[1], [0], [0], [1], [0, 0, 1, 1], [], []>} : vector<8x16xbf16>, vector<16x256xbf16>, vector<8x256xf32> -> vector<8x256xf32>
    %c0_3 = arith.constant 0 : index
    %c0_4 = arith.constant 0 : index
    %4 = vector.load %arg3[%c0_3, %c0_4] : memref<1x256xf32, #tpu.memory_space<vmem>>, vector<1x256xf32>
    %5 = vector.broadcast %4 : vector<1x256xf32> to vector<8x256xf32>
    %6 = arith.addf %3, %5 : vector<8x256xf32>
    %7 = arith.negf %6 : vector<8x256xf32>
    %8 = math.exp %7 : vector<8x256xf32>
    %cst_5 = arith.constant 1.000000e+00 : f32
    %9 = vector.broadcast %cst_5 : f32 to vector<8x256xf32>
    %10 = arith.addf %9, %8 : vector<8x256xf32>
    %11 = arith.divf %9, %10 : vector<8x256xf32>
    %12 = arith.mulf %6, %11 : vector<8x256xf32>
    %13 = arith.truncf %12 : vector<8x256xf32> to vector<8x256xbf16>
    %c0_6 = arith.constant 0 : index
    %c0_7 = arith.constant 0 : index
    %14 = vector.load %arg4[%c0_6, %c0_7] : memref<256x256xbf16, #tpu.memory_space<vmem>>, vector<256x256xbf16>
    %cst_8 = arith.constant dense<0.000000e+00> : vector<8x256xf32>
    %15 = tpu.matmul %13, %14, %cst_8 {dimension_numbers = #tpu.dot_dimension_numbers<[1], [0], [0], [1], [0, 0, 1, 1], [], []>} : vector<8x256xbf16>, vector<256x256xbf16>, vector<8x256xf32> -> vector<8x256xf32>
    %c0_9 = arith.constant 0 : index
    %c0_10 = arith.constant 0 : index
    %16 = vector.load %arg5[%c0_9, %c0_10] : memref<1x256xf32, #tpu.memory_space<vmem>>, vector<1x256xf32>
    %17 = vector.broadcast %16 : vector<1x256xf32> to vector<8x256xf32>
    %18 = arith.addf %15, %17 : vector<8x256xf32>
    %19 = arith.negf %18 : vector<8x256xf32>
    %20 = math.exp %19 : vector<8x256xf32>
    %cst_11 = arith.constant 1.000000e+00 : f32
    %21 = vector.broadcast %cst_11 : f32 to vector<8x256xf32>
    %22 = arith.addf %21, %20 : vector<8x256xf32>
    %23 = arith.divf %21, %22 : vector<8x256xf32>
    %24 = arith.mulf %18, %23 : vector<8x256xf32>
    %c0_12 = arith.constant 0 : index
    %c0_13 = arith.constant 0 : index
    %25 = vector.load %arg6[%c0_12, %c0_13] : memref<1x256xbf16, #tpu.memory_space<vmem>>, vector<1x256xbf16>
    %26 = arith.truncf %24 : vector<8x256xf32> to vector<8x256xbf16>
    %cst_14 = arith.constant dense<0.000000e+00> : vector<1x8xf32>
    %27 = tpu.matmul %25, %26, %cst_14 {dimension_numbers = #tpu.dot_dimension_numbers<[1], [1], [0], [0], [0, 0, 1, 0], [], []>} : vector<1x256xbf16>, vector<8x256xbf16>, vector<1x8xf32> -> vector<1x8xf32>
    %c0_15 = arith.constant 0 : index
    %28 = memref.load %arg7[%c0_15] : memref<1xf32, #tpu.memory_space<smem>>
    %29 = vector.broadcast %28 : f32 to vector<1x8xf32>
    %30 = arith.addf %27, %29 : vector<1x8xf32>
    %c0_16 = arith.constant 0 : index
    %c0_17 = arith.constant 0 : index
    %31 = vector.load %arg8[%c0_16, %c0_17] : memref<1x8xf32, #tpu.memory_space<vmem>>, vector<1x8xf32>
    tpu.vector_store %arg8[%c0_16, %c0_17], %30 {strides = array<i32>} : memref<1x8xf32, #tpu.memory_space<vmem>>, vector<1x8xf32>,
    return
  }
  func.func @transform_0(%arg0: i32) -> (i32, i32) {
    %c0_i32 = arith.constant 0 : i32
    %c0_i32_0 = arith.constant 0 : i32
    return %arg0, %c0_i32 : i32, i32
  }
  func.func @transform_1(%arg0: i32) -> (i32, i32) {
    %c0_i32 = arith.constant 0 : i32
    %c0_i32_0 = arith.constant 0 : i32
    %c0_i32_1 = arith.constant 0 : i32
    return %c0_i32, %c0_i32_0 : i32, i32
  }
  func.func @transform_2(%arg0: i32) -> (i32, i32) {
    %c0_i32 = arith.constant 0 : i32
    %c0_i32_0 = arith.constant 0 : i32
    %c0_i32_1 = arith.constant 0 : i32
    return %c0_i32, %c0_i32_0 : i32, i32
  }
  func.func @transform_3(%arg0: i32) -> (i32, i32) {
    %c0_i32 = arith.constant 0 : i32
    %c0_i32_0 = arith.constant 0 : i32
    %c0_i32_1 = arith.constant 0 : i32
    return %c0_i32, %c0_i32_0 : i32, i32
  }
  func.func @transform_4(%arg0: i32) -> (i32, i32) {
    %c0_i32 = arith.constant 0 : i32
    %c0_i32_0 = arith.constant 0 : i32
    %c0_i32_1 = arith.constant 0 : i32
    return %c0_i32, %c0_i32_0 : i32, i32
  }
  func.func @transform_5(%arg0: i32) -> (i32, i32) {
    %c0_i32 = arith.constant 0 : i32
    %c0_i32_0 = arith.constant 0 : i32
    %c0_i32_1 = arith.constant 0 : i32
    return %c0_i32, %c0_i32_0 : i32, i32
  }
  func.func @transform_6(%arg0: i32) -> i32 {
    %c0_i32 = arith.constant 0 : i32
    %c0_i32_0 = arith.constant 0 : i32
    return %c0_i32 : i32
  }
  func.func @transform_7(%arg0: i32) -> (i32, i32) {
    %c0_i32 = arith.constant 0 : i32
    %c0_i32_0 = arith.constant 0 : i32
    return %c0_i32, %arg0 : i32, i32
  }
}

</mosaic_0001>

<bundles_post_ra>
// kernel: value_network_forward.1
= control target key start
LH: loop header
LB: loop body
LE: loop exit
PB: predicated region body
PF: predicated region fallthrough
CT: control target
= control target key end

     0   :  { %v595_v2 = vmov 0   ;;  %vm55_vm0 = vcmask 130048   ;;  %s767_s0 = inlined_call_operand.vmem [shape: f32[8,16], index: 0, kind: input, shape index: {}]   ;;  %s768_s1 = inlined_call_operand.vmem [shape: bf16[16,256], index: 1, kind: input, shape index: {}]   ;;  %s769_s2 = inlined_call_operand.vmem [shape: f32[1,256], index: 2, kind: input, shape index: {}]   ;;  %s770_s3 = inlined_call_operand.vmem [shape: bf16[256,256], index: 3, kind: input, shape index: {}]   ;;  %s771_s4 = inlined_call_operand.vmem [shape: f32[1,256], index: 4, kind: input, shape index: {}]   ;;  %s772_s5 = inlined_call_operand.vmem [shape: bf16[1,256], index: 5, kind: input, shape index: {}]   ;;  %s773_s6 = inlined_call_operand.<no memory space> [shape: f32[1], index: 6, kind: input, shape index: {}]   ;;  %s774_s7 = inlined_call_operand.hbm [shape: f32[1,8], index: 7, kind: output, shape index: {}]  }
   0x1   :  { %v504_v0 = vld [vmem:[%s768_s1 + $0x4] ss:$8 sps:$4 sm:$0xff]   ;;  %v506_v1 = vld [vmem:[%s768_s1] ss:$8 sps:$4 sm:$0xff]   ;;  %91 = vmatprep.mubr.bf16.mxu0 %v595_v2  ;;  %v510_v7 = vld [vmem:[%s770_s3 + $0x14] ss:$8 sps:$4 sm:$0xff]  }
   0x2   :  { %v29_v3 = vld [vmem:[%s767_s0] sm:$0xff]  ;;  %59 = vmatprep.subr.bf16.mxu0 %v504_v0  ;;  %v512_v8 = vld [vmem:[%s770_s3 + $0x10] ss:$8 sps:$4 sm:$0xff]   ;;  %v516_v11 = vld [vmem:[%s770_s3 + $0x34] ss:$8 sps:$4 sm:$0xff]  }
   0x3   :  { %v30_v4 = vpack.c.bf16 %v29_v3, %v29_v3  ;;  %v507_v5 = vld [vmem:[%s770_s3 + $0x4] ss:$8 sps:$4 sm:$0xff]   ;;  %v509_v6 = vld [vmem:[%s770_s3] ss:$8 sps:$4 sm:$0xff]   ;;  %60 = vmatpush1.bf16.msra.mxu0 %v506_v1  ;;  %v518_v12 = vld [vmem:[%s770_s3 + $0x30] ss:$8 sps:$4 sm:$0xff]  }
   0x4   :  { %320 = vmatprep.subr.bf16.mxu1 %v507_v5  ;;  %v513_v9 = vld [vmem:[%s770_s3 + $0x24] ss:$8 sps:$4 sm:$0xff]   ;;  %v515_v10 = vld [vmem:[%s770_s3 + $0x20] ss:$8 sps:$4 sm:$0xff]  }
   0x5   :  { %321 = vmatpush1.bf16.msra.mxu1 %v509_v6  ;;  %v519_v13 = vld [vmem:[%s770_s3 + $0x44] ss:$8 sps:$4 sm:$0xff]   ;;  %v521_v14 = vld [vmem:[%s770_s3 + $0x40] ss:$8 sps:$4 sm:$0xff]  }
   0x6   :  { %463 = vmatmul.mubr.msk.bf16.vlgmr.msra.gmra.mrb[0].mxu0 %vm55_vm0, %v30_v4  ;;  %322 = vmatprep.subr.bf16.mxu1 %v510_v7 }
   0x9   :  { %323 = vmatpush1.bf16.msra.mxu1 %v512_v8 }
   0xa   :  { %324 = vmatprep.subr.bf16.mxu1 %v513_v9 }
   0xd   :  { %325 = vmatpush1.bf16.msra.mxu1 %v515_v10 }
   0xe   :  { %326 = vmatprep.subr.bf16.mxu1 %v516_v11 }
  0x11   :  { %327 = vmatpush1.bf16.msra.mxu1 %v518_v12 }
  0x12   :  { %13 = vsyncpa [#allocation4], 0  ;;  %328 = vmatprep.subr.bf16.mxu1 %v519_v13  ;;  %v522_v15 = vld [vmem:[%s770_s3 + $0x54] ss:$8 sps:$4 sm:$0xff]   ;;  %v524_v16 = vld [vmem:[%s770_s3 + $0x50] ss:$8 sps:$4 sm:$0xff]   ;;  %v35_v37 = vlaneseq }
  0x13   :  { %v525_v17 = vld [vmem:[%s770_s3 + $0x64] ss:$8 sps:$4 sm:$0xff]   ;;  %v527_v18 = vld [vmem:[%s770_s3 + $0x60] ss:$8 sps:$4 sm:$0xff]   ;;  %v528_v19 = vld [vmem:[%s770_s3 + $0x74] ss:$8 sps:$4 sm:$0xff]  }
  0x14   :  { %v530_v20 = vld [vmem:[%s770_s3 + $0x70] ss:$8 sps:$4 sm:$0xff]   ;;  %v531_v21 = vld [vmem:[%s770_s3 + $0x84] ss:$8 sps:$4 sm:$0xff]   ;;  %v533_v22 = vld [vmem:[%s770_s3 + $0x80] ss:$8 sps:$4 sm:$0xff]  }
  0x15   :  { %329 = vmatpush1.bf16.msra.mxu1 %v521_v14  ;;  %v534_v23 = vld [vmem:[%s770_s3 + $0x94] ss:$8 sps:$4 sm:$0xff]   ;;  %v536_v24 = vld [vmem:[%s770_s3 + $0x90] ss:$8 sps:$4 sm:$0xff]   ;;  %v537_v25 = vld [vmem:[%s770_s3 + $0xa4] ss:$8 sps:$4 sm:$0xff]  }
  0x16   :  { %330 = vmatprep.subr.bf16.mxu1 %v522_v15  ;;  %v539_v26 = vld [vmem:[%s770_s3 + $0xa0] ss:$8 sps:$4 sm:$0xff]   ;;  %v540_v27 = vld [vmem:[%s770_s3 + $0xb4] ss:$8 sps:$4 sm:$0xff]   ;;  %v542_v28 = vld [vmem:[%s770_s3 + $0xb0] ss:$8 sps:$4 sm:$0xff]  }
  0x17   :  { %v543_v29 = vld [vmem:[%s770_s3 + $0xc4] ss:$8 sps:$4 sm:$0xff]   ;;  %v545_v30 = vld [vmem:[%s770_s3 + $0xc0] ss:$8 sps:$4 sm:$0xff]   ;;  %v546_v31 = vld [vmem:[%s770_s3 + $0xd4] ss:$8 sps:$4 sm:$0xff]  }
  0x18   :  { %v548_v32 = vld [vmem:[%s770_s3 + $0xd0] ss:$8 sps:$4 sm:$0xff]   ;;  %v549_v33 = vld [vmem:[%s770_s3 + $0xe4] ss:$8 sps:$4 sm:$0xff]   ;;  %v551_v34 = vld [vmem:[%s770_s3 + $0xe0] ss:$8 sps:$4 sm:$0xff]  }
  0x19   :  { %331 = vmatpush1.bf16.msra.mxu1 %v524_v16  ;;  %v552_v35 = vld [vmem:[%s770_s3 + $0xf4] ss:$8 sps:$4 sm:$0xff]   ;;  %v554_v36 = vld [vmem:[%s770_s3 + $0xf0] ss:$8 sps:$4 sm:$0xff]   ;;  %v36_v38 = vshrl.u32 %v35_v37, 7  ;;  %s597_s23 = smov [#allocation3]  }
  0x1a   :  { %332 = vmatprep.subr.bf16.mxu1 %v525_v17  ;;  %v33_v40 = vld [vmem:[%s769_s2] sm:$0x3]  ;;  %v596_v62 = vmov 1966171168   ;;  %s453_s24 = sshll.u32 %s597_s23, 4  ;;  %vm445_vm1 = vcmask 57344   ;;  %s454_s24 = int_to_ptr.vmem [resolvable:$true] %s453_s24 }
  0x1b   :  { %v37_v39 = vsub.s32 0, %v36_v38  ;;  %v41_v41 = vsub.s32 1, %v36_v38  ;;  %v390_v63 = vunpack.c.l.s4 %v596_v62  ;;  %v500_v0 = vld.sshfl [vmem:[%s772_s5] sm:$0x11 pattern:$0x75316420]  ;;  %p576_p1 = scmp.lt.s32.totalorder %s454_s24, %s454_s24 }
  0x1c   :  { %v388_v2 = vcombine.high %v500_v0, %v500_v0  ;;  %v148_v6 = vld [vmem:[%s771_s4] sm:$0x3]  ;;  %s571_s25 = scalar_lea.vmem %s454_s24, 16  ;;  %s575_s26 = scalar_lea.vmem %s454_s24, 32 }
  0x1d   :  { %333 = vmatpush1.bf16.msra.mxu1 %v527_v18  ;;  %v38_v42 = vrot.slane %v33_v40, %v37_v39  ;;  %v42_v43 = vrot.slane %v33_v40, %v41_v41  ;;  %v391_v1 = vunpack.c.0.s8 %v390_v63  ;;  %v153_v7 = vrot.slane %v148_v6, %v37_v39  ;;  %p572_p0 = scmp.ne.s32.totalorder %s454_s24, %s571_s25  ;;  %p577_p2 = scmp.lt.s32.totalorder %s575_s26, %s571_s25 }
  0x1e   :  { %334 = vmatprep.subr.bf16.mxu1 %v528_v19  ;;  %v157_v8 = vrot.slane %v148_v6, %v41_v41 }
  0x1f   :  { %v394_v3 = vsub.s32 %v391_v1, %v36_v38  ;;  %p578_p3 = por %p577_p2, %p576_p1 }
  0x21   :  { %335 = vmatpush1.bf16.msra.mxu1 %v530_v20  ;;  %v402_v4 = vrot.slane %v388_v2, %v394_v3  ;;  %v395_v5 = vrot.slane %v500_v0, %v394_v3  ;;  %p579_p4 = pnand %p578_p3, %p572_p0 }
  0x22   :  { %336 = vmatprep.subr.bf16.mxu1 %v531_v21 }
  0x23   :  { %437 = vmatprep.mubr.bf16.mxu0 %v402_v4 }
  0x25   :  { %337 = vmatpush1.bf16.msra.mxu1 %v533_v22 }
  0x26   :  { %338 = vmatprep.subr.bf16.mxu1 %v534_v23 }
  0x29   :  { %339 = vmatpush1.bf16.msra.mxu1 %v536_v24 }
  0x2a   :  { %340 = vmatprep.subr.bf16.mxu1 %v537_v25 }
  0x2d   :  { %341 = vmatpush1.bf16.msra.mxu1 %v539_v26 }
  0x2e   :  { %342 = vmatprep.subr.bf16.mxu1 %v540_v27  ;;  %v379_v27 = vstv %s773_s6 }
  0x31   :  { %343 = vmatpush1.bf16.msra.mxu1 %v542_v28 }
  0x32   :  { %344 = vmatprep.subr.bf16.mxu1 %v543_v29 }
  0x35   :  { %345 = vmatpush1.bf16.msra.mxu1 %v545_v30 }
  0x36   :  { %346 = vmatprep.subr.bf16.mxu1 %v546_v31 }
  0x39   :  { %347 = vmatpush1.bf16.msra.mxu1 %v548_v32 }
  0x3a   :  { %348 = vmatprep.subr.bf16.mxu1 %v549_v33 }
  0x3d   :  { %349 = vmatpush1.bf16.msra.mxu1 %v551_v34 }
  0x3e   :  { %350 = vmatprep.subr.bf16.mxu1 %v552_v35 }
  0x41   :  { %351 = vmatpush1.bf16.msra.mxu1 %v554_v36 }
  0xd9   :  { %v93_v44 = vpop.f32.mrb[0].mxu0 }
  0xda   :  { %v94_v45 = vadd.f32 %v93_v44, %v38_v42  ;;  %v95_v46 = vpop.f32.mrb[1].mxu0 }
  0xdb   :  { %v96_v47 = vadd.f32 %v95_v46, %v42_v43  ;;  %v97_v48 = vpop.f32.mrb[2].mxu0 }
  0xdc   :  { %v464_v49 = vmul.f32 -1.442695, %v94_v45  ;;  %v98_v50 = vpop.f32.mrb[3].mxu0 }
  0xdd   :  { %v465_v51 = vmul.f32 -1.442695, %v96_v47 }
  0xde   :  { %555 = vpow2.f32 %v464_v49 }
  0xdf   :  { %557 = vpow2.f32 %v465_v51 }
  0xe8   :  { %v556_v52 = vpop.eup %555 }
  0xe9   :  { %v558_v53 = vpop.eup %557  ;;  %v106_v54 = vadd.f32 1.0, %v556_v52 }
  0xea   :  { %v107_v55 = vadd.f32 1.0, %v558_v53 }
  0xeb   :  { %559 = vrcp.f32 %v106_v54 }
  0xec   :  { %561 = vrcp.f32 %v107_v55 }
  0xf5   :  { %v560_v56 = vpop.eup %559 }
  0xf6   :  { %v562_v57 = vpop.eup %561  ;;  %v112_v58 = vmul.f32 %v560_v56, %v94_v45 }
  0xf7   :  { %v113_v59 = vmul.f32 %v562_v57, %v96_v47 }
  0xf8   :  { %v114_v61 = vpack.c.bf16 %v112_v58, %v112_v58 }
  0xf9   :  { %v115_v60 = vpack.c.bf16 %v113_v59, %v113_v59 }
  0xfb   :  { %352 = vmatprep.mubr.bf16.mxu1 %v115_v60 }
  0xfc   :  { %353 = vmatmul.mubr.bf16.vlgmr.msra.gmra.mrb[0].mxu1 %v114_v61 }
 0x1cf   :  { %v354_v9 = vpop.f32.mrb[0].mxu1 }
 0x1d0   :  { %v355_v10 = vadd.f32 %v354_v9, %v153_v7  ;;  %v356_v11 = vpop.f32.mrb[1].mxu1 }
 0x1d1   :  { %v357_v12 = vadd.f32 %v356_v11, %v157_v8  ;;  %v358_v13 = vpop.f32.mrb[2].mxu1 }
 0x1d2   :  { %v498_v14 = vmul.f32 -1.442695, %v355_v10  ;;  %v359_v15 = vpop.f32.mrb[3].mxu1 }
 0x1d3   :  { %v499_v16 = vmul.f32 -1.442695, %v357_v12 }
 0x1d4   :  { %563 = vpow2.f32 %v498_v14 }
 0x1d5   :  { %565 = vpow2.f32 %v499_v16 }
 0x1de   :  { %v564_v17 = vpop.eup %563 }
 0x1df   :  { %v566_v18 = vpop.eup %565  ;;  %v367_v19 = vadd.f32 1.0, %v564_v17 }
 0x1e0   :  { %v368_v20 = vadd.f32 1.0, %v566_v18 }
 0x1e1   :  { %567 = vrcp.f32 %v367_v19 }
 0x1e2   :  { %569 = vrcp.f32 %v368_v20 }
 0x1eb   :  { %v568_v21 = vpop.eup %567 }
 0x1ec   :  { %v570_v22 = vpop.eup %569  ;;  %v373_v23 = vmul.f32 %v568_v21, %v355_v10 }
 0x1ed   :  { %v374_v24 = vmul.f32 %v570_v22, %v357_v12 }
 0x1ee   :  { %v376_v26 = vpack.c.bf16 %v373_v23, %v373_v23 }
 0x1ef   :  { %v377_v25 = vpack.c.bf16 %v374_v24, %v374_v24 }
 0x1f1   :  { %405 = vmatprep.subr.bf16.mxu0 %v377_v25 }
 0x1f2   :  { %406 = vmatpush1.bf16.xpose.msra.mxu0 %v376_v26 }
 0x1f9   :  { %438 = vmatmul.mubr.bf16.vlgmr.msra.gmra.mrb[4].mxu0 %v395_v5 }
 0x2cc   :  { %v439_v28 = vpop.f32.mrb[4].mxu0 }
 0x2cd   :  { %v440_v29 = vadd.f32 %v439_v28, %v379_v27  ;;  %v441_v30 = vpop.f32.mrb[5].mxu0 }
 0x2ce   :  { %v442_v31 = vpop.f32.mrb[6].mxu0 }
 0x2cf   :  { %v443_v32 = vpop.f32.mrb[7].mxu0  ;;  %446 = vst.msk [vmem:[#allocation3] sm:$0x1] %vm445_vm1, %v440_v29 }
 0x2d0   :  { %582 = shalt.err (!%p579_p4)
}
 0x2d1   :  { %s583_s28 = scalar_lea.hbm %s774_s7, 16 }
 0x2d2   :  { %p584_p5 = scmp.ne.s32.totalorder %s774_s7, %s583_s28  ;;  %p587_p6 = scmp.lt.u32.totalorder %s583_s28, %s774_s7 }
 0x2d4   :  { %p589_p7 = pnand %p587_p6, %p584_p5 }
 0x2d6   :  { %592 = shalt.err (!%p589_p7)
}
 0x2d7   :  { %456 = dma.vmem_to_hbm [thread:$0]  %s454_s24, 16, %s774_s7, [#allocation4]  }
 0x2d8   :  { %593 = dma.done.wait [#allocation4], 16  }
 0x2d9   :  { %594 = vsyncadd [#allocation4], 4294967280 }
 0x2da   :  { %460 = vsyncpa [#allocation4], 1 }

</bundles_post_ra>
